<compile_context>
chip_gen: v7x
topology: tpu7x:2x2x1
jax: 0.10.0
libtpu: 0.0.40
codegen_flags: <defaults>
</compile_context>

<pallas_src>
import functools

import jax
import jax.numpy as jnp
from jax.experimental import pallas as pl
from jax.experimental.pallas import tpu as pltpu

_LANES = 128          # lane width of a vreg
_MAX_TILE_SUB = 1024  # (1024, 128) f32 tile = 512 KiB -> ~2 MiB double-buffered, v7x-safe
_SUB_ALIGN = 16       # sublane alignment (covers f32 (8,128) and bf16 (16,128) tiling)
_NCORES = 2           # split tiles across v7x's 2 TensorCores; harmless on v5e/v6e


def _cdiv(a, b):
    return -(-a // b)


def _round_up(x, m):
    return ((x + m - 1) // m) * m


def _focal_loss_kernel(p_ref, w_ref, out_ref, *, gamma):
    j = pl.program_id(1)

    @pl.when(j == 0)
    def _():
        out_ref[...] = jnp.zeros_like(out_ref)

    p = p_ref[...].astype(jnp.float32)     # (tile_sub, 128), cast on-chip
    w = w_ref[...]                         # (tile_sub, 128) f32: alpha on target, 0 else

    p = jnp.maximum(p, jnp.float32(1e-9))  # torch.maximum(preds_softmax, 1e-9)
    one_minus = 1.0 - p

    g = float(gamma)
    if g.is_integer() and 0 <= int(g) <= 8:
        # small integer gamma -> VPU multiplies, no EUP pow (exp/log) per element
        focal = jnp.ones_like(one_minus)
        for _ in range(int(g)):
            focal = focal * one_minus
    else:
        focal = jnp.power(one_minus, jnp.float32(g))

    # w is zero everywhere except each row's target-class element (and in padding),
    # so this masked elementwise sum equals sum_r -alpha[label_r]*(1-pt_r)^g*log(pt_r).
    tile_loss = -jnp.sum(w * focal * jnp.log(p))

    out_ref[...] += tile_loss   # scalar broadcast into this core's resident (1,8,128) block


def focal_loss2_pallas(preds_softmax, labels, *, alpha=0.25, gamma=2,
                       num_classes=2, size_average=True):
    """Forward pass equivalent to focal_loss2.forward. Returns a scalar f32."""
    # Parameter setup (mirrors __init__).
    if isinstance(alpha, (list, tuple)):
        assert len(alpha) == num_classes
        alpha_vec = jnp.asarray(alpha, dtype=jnp.float32)
    else:
        assert alpha < 1
        alpha_vec = jnp.concatenate([
            jnp.array([alpha], dtype=jnp.float32),
            jnp.full((num_classes - 1,), 1.0 - alpha, dtype=jnp.float32),
        ])

    C = preds_softmax.shape[-1]
    assert C == num_classes
    p2d = preds_softmax.reshape(-1, C)                 # (R, C), keep native dtype on the wire
    lab = labels.reshape(-1).astype(jnp.int32)         # (R,)
    R = p2d.shape[0]

    # Lane-dense weight slab: alpha[c] on the target class, 0 elsewhere (folds the
    # label one-hot mask and the alpha gather into a single slab).
    col = jax.lax.broadcasted_iota(jnp.int32, (R, C), 1)
    onehot = col == lab[:, None]
    w2d = jnp.where(onehot, alpha_vec[None, :], jnp.float32(0.0)).astype(jnp.float32)

    # Flatten to a lane-dense (M_pad, 128) slab, padded so it splits evenly into
    # ncores * tiles_per_core tiles of (tile_sub, 128).
    E = R * C
    M = max(1, _cdiv(E, _LANES))
    ncores = _NCORES
    tile_sub = min(_MAX_TILE_SUB,
                   max(_SUB_ALIGN, _round_up(_cdiv(M, ncores), _SUB_ALIGN)))
    M_pad = _round_up(M, ncores * tile_sub)
    tiles_per_core = M_pad // (ncores * tile_sub)
    E_pad = M_pad * _LANES

    p_flat = jnp.pad(p2d.reshape(E), (0, E_pad - E), constant_values=1.0)  # log(1) = 0
    w_flat = jnp.pad(w2d.reshape(E), (0, E_pad - E), constant_values=0.0)
    p_slab = p_flat.reshape(M_pad, _LANES)
    w_slab = w_flat.reshape(M_pad, _LANES)

    idx_map = lambda c, j: (c * tiles_per_core + j, 0)

    kernel = functools.partial(_focal_loss_kernel, gamma=float(gamma))

    bytes_accessed = (int(p_slab.size) * p_slab.dtype.itemsize
                      + int(w_slab.size) * 4
                      + ncores * 8 * _LANES * 4)

    partials = pl.pallas_call(
        kernel,
        out_shape=jax.ShapeDtypeStruct((ncores, 8, _LANES), jnp.float32),
        grid=(ncores, tiles_per_core),
        in_specs=[
            pl.BlockSpec((tile_sub, _LANES), idx_map),
            pl.BlockSpec((tile_sub, _LANES), idx_map),
        ],
        out_specs=pl.BlockSpec((1, 8, _LANES), lambda c, j: (c, 0, 0)),
        compiler_params=pltpu.CompilerParams(
            dimension_semantics=("parallel", "arbitrary")),
        cost_estimate=pl.CostEstimate(
            flops=6 * E_pad, transcendentals=E_pad, bytes_accessed=bytes_accessed),
    )(p_slab, w_slab)

    total = jnp.sum(partials[:, 0, 0])     # one partial sum per core
    if size_average:
        total = total / jnp.float32(R)     # true R, not the padded element count
    return total


def _reference(preds_softmax, labels, *, alpha, gamma, num_classes, size_average):
    """Pure-JAX re-implementation of the torch forward, for checking."""
    if isinstance(alpha, (list, tuple)):
        alpha_vec = jnp.asarray(alpha, dtype=jnp.float32)
    else:
        alpha_vec = jnp.concatenate([
            jnp.array([alpha], dtype=jnp.float32),
            jnp.full((num_classes - 1,), 1.0 - alpha, dtype=jnp.float32),
        ])
    C = preds_softmax.shape[-1]
    p = jnp.maximum(preds_softmax.reshape(-1, C).astype(jnp.float32), 1e-9)
    lab = labels.reshape(-1)
    rows = jnp.arange(p.shape[0])
    pt = p[rows, lab]
    logpt = jnp.log(p)[rows, lab]
    a = alpha_vec[lab]
    loss = -a * jnp.power(1.0 - pt, float(gamma)) * logpt
    return jnp.mean(loss) if size_average else jnp.sum(loss)


if __name__ == "__main__":
    key = jax.random.PRNGKey(0)
    k1, k2 = jax.random.split(key)

    # Small detection-style input: [B, N, C] probs, [B, N] labels, num_classes = 2.
    B, N, C = 2, 8, 2
    logits = jax.random.normal(k1, (B, N, C), dtype=jnp.float32)
    preds_softmax = jax.nn.softmax(logits, axis=-1)
    labels = jax.random.randint(k2, (B, N), 0, C, dtype=jnp.int32)

    loss = focal_loss2_pallas(preds_softmax, labels, alpha=0.25, gamma=2,
                              num_classes=C, size_average=True)
    jax.block_until_ready(loss)
    ref = _reference(preds_softmax, labels, alpha=0.25, gamma=2,
                     num_classes=C, size_average=True)
    assert jnp.allclose(loss, ref, atol=1e-6, rtol=1e-5), (loss, ref)

    # Second check: enough rows that both grid cores get real data, list-alpha, sum mode.
    k3, k4 = jax.random.split(k1)
    B2, N2 = 2, 1024
    logits2 = jax.random.normal(k3, (B2, N2, C), dtype=jnp.float32)
    preds2 = jax.nn.softmax(logits2, axis=-1)
    labels2 = jax.random.randint(k4, (B2, N2), 0, C, dtype=jnp.int32)

    loss2 = focal_loss2_pallas(preds2, labels2, alpha=[0.3, 0.7], gamma=2,
                               num_classes=C, size_average=False)
    jax.block_until_ready(loss2)
    ref2 = _reference(preds2, labels2, alpha=[0.3, 0.7], gamma=2,
                      num_classes=C, size_average=False)
    assert jnp.allclose(loss2, ref2, atol=1e-2, rtol=1e-4), (loss2, ref2)

    print("KERNEL_OK")
</pallas_src>

<mosaic_0001>
module attributes {stable_mosaic.version = 11 : i64} {
  func.func @_focal_loss_kernel(%arg0: i32, %arg1: i32, %arg2: memref<16x128xf32, #tpu.memory_space<vmem>>, %arg3: memref<16x128xf32, #tpu.memory_space<vmem>>, %arg4: memref<1x8x128xf32, #tpu.memory_space<vmem>>) attributes {dimension_semantics = [#tpu.dimension_semantics<parallel>, #tpu.dimension_semantics<arbitrary>], iteration_bounds = array<i64: 2, 1>, scalar_prefetch = 0 : i64, scratch_operands = 0 : i64, tpu.core_type = #tpu.core_type<tc>, window_params = [{transform_indices = @transform_0, window_bounds = array<i64: 16, 128>}, {transform_indices = @transform_1, window_bounds = array<i64: 16, 128>}, {transform_indices = @transform_2, window_bounds = array<i64: 1, 8, 128>}]} {
    %c0_i32 = arith.constant 0 : i32
    %0 = arith.cmpi eq, %arg1, %c0_i32 : i32
    %1 = arith.extui %0 : i1 to i32
    %c0_i32_0 = arith.constant 0 : i32
    %2 = arith.cmpi ne, %1, %c0_i32_0 : i32
    scf.if %2 {
      %cst_14 = arith.constant 0.000000e+00 : f32
      %24 = vector.broadcast %cst_14 : f32 to vector<1x8x128xf32>
      %c0_15 = arith.constant 0 : index
      %c0_16 = arith.constant 0 : index
      %c0_17 = arith.constant 0 : index
      %25 = vector.load %arg4[%c0_15, %c0_16, %c0_17] : memref<1x8x128xf32, #tpu.memory_space<vmem>>, vector<1x8x128xf32>
      tpu.vector_store %arg4[%c0_15, %c0_16, %c0_17], %24 {strides = array<i32>} : memref<1x8x128xf32, #tpu.memory_space<vmem>>, vector<1x8x128xf32>,
    } else {
    }
    %c0 = arith.constant 0 : index
    %c0_1 = arith.constant 0 : index
    %3 = vector.load %arg2[%c0, %c0_1] : memref<16x128xf32, #tpu.memory_space<vmem>>, vector<16x128xf32>
    %c0_2 = arith.constant 0 : index
    %c0_3 = arith.constant 0 : index
    %4 = vector.load %arg3[%c0_2, %c0_3] : memref<16x128xf32, #tpu.memory_space<vmem>>, vector<16x128xf32>
    %cst = arith.constant 9.99999971E-10 : f32
    %5 = vector.broadcast %cst : f32 to vector<16x128xf32>
    %6 = arith.maximumf %3, %5 : vector<16x128xf32>
    %cst_4 = arith.constant 1.000000e+00 : f32
    %7 = vector.broadcast %cst_4 : f32 to vector<16x128xf32>
    %8 = arith.subf %7, %6 : vector<16x128xf32>
    %cst_5 = arith.constant 1.000000e+00 : f32
    %9 = vector.broadcast %cst_5 : f32 to vector<16x128xf32>
    %10 = arith.mulf %9, %8 : vector<16x128xf32>
    %11 = arith.mulf %10, %8 : vector<16x128xf32>
    %12 = arith.mulf %4, %11 : vector<16x128xf32>
    %13 = math.log %6 : vector<16x128xf32>
    %14 = arith.mulf %12, %13 : vector<16x128xf32>
    %15 = vector.shape_cast %14 : vector<16x128xf32> to vector<1x16x128xf32>
    %cst_6 = arith.constant dense<0.000000e+00> : vector<1xf32>
    %16 = vector.multi_reduction <add>, %15, %cst_6 [1, 2] : vector<1x16x128xf32> to vector<1xf32>
    %17 = vector.shape_cast %16 : vector<1xf32> to vector<1x1x1xf32>
    %18 = vector.extract %17[0, 0, 0] : f32 from vector<1x1x1xf32>
    %cst_7 = arith.constant 0.000000e+00 : f32
    %19 = arith.subf %cst_7, %18 : f32
    %c0_8 = arith.constant 0 : index
    %c0_9 = arith.constant 0 : index
    %c0_10 = arith.constant 0 : index
    %20 = vector.load %arg4[%c0_8, %c0_9, %c0_10] : memref<1x8x128xf32, #tpu.memory_space<vmem>>, vector<1x8x128xf32>
    %21 = vector.broadcast %19 : f32 to vector<1x8x128xf32>
    %22 = arith.addf %20, %21 : vector<1x8x128xf32>
    %c0_11 = arith.constant 0 : index
    %c0_12 = arith.constant 0 : index
    %c0_13 = arith.constant 0 : index
    %23 = vector.load %arg4[%c0_11, %c0_12, %c0_13] : memref<1x8x128xf32, #tpu.memory_space<vmem>>, vector<1x8x128xf32>
    tpu.vector_store %arg4[%c0_11, %c0_12, %c0_13], %22 {strides = array<i32>} : memref<1x8x128xf32, #tpu.memory_space<vmem>>, vector<1x8x128xf32>,
    return
  }
  func.func @transform_0(%arg0: i32, %arg1: i32) -> (i32, i32) {
    %c1_i32 = arith.constant 1 : i32
    %0 = arith.muli %arg0, %c1_i32 : i32
    %1 = arith.addi %0, %arg1 : i32
    %c0_i32 = arith.constant 0 : i32
    %c0_i32_0 = arith.constant 0 : i32
    return %1, %c0_i32 : i32, i32
  }
  func.func @transform_1(%arg0: i32, %arg1: i32) -> (i32, i32) {
    %c1_i32 = arith.constant 1 : i32
    %0 = arith.muli %arg0, %c1_i32 : i32
    %1 = arith.addi %0, %arg1 : i32
    %c0_i32 = arith.constant 0 : i32
    %c0_i32_0 = arith.constant 0 : i32
    return %1, %c0_i32 : i32, i32
  }
  func.func @transform_2(%arg0: i32, %arg1: i32) -> (i32, i32, i32) {
    %c0_i32 = arith.constant 0 : i32
    %c0_i32_0 = arith.constant 0 : i32
    %c0_i32_1 = arith.constant 0 : i32
    return %arg0, %c0_i32, %c0_i32_0 : i32, i32, i32
  }
}

</mosaic_0001>

<bundles_post_ra>
// kernel: tpu_custom_call.1
= control target key start
LH: loop header
LB: loop body
LE: loop exit
PB: predicated region body
PF: predicated region fallthrough
CT: control target
= control target key end

     0   :  { %7 = vsyncpa [#allocation3], 0  ;;  %s878_s0 = inlined_call_operand.hbm [shape: f32[32,128], index: 0, kind: input, shape index: {}]   ;;  %s879_s1 = inlined_call_operand.hbm [shape: f32[32,128], index: 1, kind: input, shape index: {}]   ;;  %s880_s2 = inlined_call_operand.hbm [shape: f32[2,8,128], index: 2, kind: output, shape index: {}]  }
   0x1   :  { %9 = vsyncpa [#allocation3 + $0x1], 0 }
   0x2   :  { %10 = vsyncpa [#allocation6], 0 }
   0x3   :  { %12 = vsyncpa [#allocation6 + $0x1], 0 }
   0x4   :  { %13 = vsyncpa [#allocation4], 0 }
   0x5   :  { %15 = vsyncpa [#allocation4 + $0x1], 0  ;;  %s643_s9 = smov 0   ;;  %s645_s10 = smov 0  }
   0x6   :  { %s647_s11 = smov 0   ;;  %s649_s12 = smov 0  }
   0x7   :  { %s651_s13 = smov 0   ;;  %s653_s14 = smov 0  }
   0x8 LB: > { %s379_s15 = sadd.s32 4294967295, %s621_s14   ;;  %s380_s16 = sadd.s32 4294967294, %s621_s14   ;;  %s621_s14 = sphi %s653_s14, %s21_s14   ;;  %s617_s13 = sphi %s651_s13, %s898_s13   ;;  %s613_s12 = sphi %s649_s12, %s897_s12   ;;  %s609_s11 = sphi %s647_s11, %s896_s11   ;;  %s605_s10 = sphi %s645_s10, %s895_s10   ;;  %s601_s9 = sphi %s643_s9, %s894_s9  }
   0x9   : > { %s33_s17 = sadd.s32 1, %s617_s13  ;;  %s42_s18 = sadd.s32 1, %s609_s11 }
   0xa   : > { %p35_p0 = scmp.ge.s32.totalorder %s33_s17, 2  ;;  %p49_p1 = scmp.ne.s32.totalorder %s609_s11, %s605_s10 }
   0xb   : > { %p50_p2 = scmp.eq.s32.totalorder %s621_s14, 0  ;;  %p55_p3 = scmp.ne.s32.totalorder %s605_s10, %s601_s9 }
   0xc   : > { %s900_s17 = smov (%p35_p0, %s33_s17), 0  ;;  %p56_p5 = scmp.eq.s32.totalorder %s379_s15, 0 }
   0xd   : > { %p684_p4 = por %p50_p2, %p49_p1  ;;  %s39_s20 = ssub.s32 %s617_s13, %s900_s17 }
   0xe   : > { %p107_p6 = scmp.eq.s32.totalorder %s379_s15, 1  ;;  %p40_p7 = scmp.eq.s32.totalorder %s39_s20, 0 }
   0xf   : > { %p690_p8 = por %p56_p5, %p55_p3  ;;  %p113_p10 = scmp.eq.s32.totalorder %s380_s16, 1 }
  0x10   : > { %p694_p9 = por %p107_p6, %p49_p1  ;;  %p418_p13 = scmp.lt.s32.totalorder %s621_s14, 2 }
  0x11   : > { %s884_s21 = scalar_select %p690_p8, 1, 0 }
  0x12   : > { %s885_s22 = scalar_select %p694_p9, 1, 0 }
  0x13   : > { %s699_s23 = scalar_select %p40_p7, %s609_s11, %s42_s18  }
  0x14   : > { %p701_p11 = por %p113_p10, %p55_p3  ;;  %s708_s25 = sand.u32 1, %s609_s11  }
  0x15   : > { %s383_s26 = sshll.u32 %s708_s25, 4  ;;  %s397_s27 = sshll.u32 %s617_s13, 8 }
  0x16   : > { %s886_s24 = scalar_select %p701_p11, 1, 0 }
  0x17   : > { %s717_s30 = scalar_lea.hbm %s878_s0, %s397_s27  ;;  %s137_s3 = scalar_lea.vmem [#allocation2], %s383_s26 }
  0x18   : > { %s145_s4 = sshll.u32 %s137_s3, 4  ;;  %p725_p0 = pnand %p418_p13, %p684_p4  ;;  %s721_s4 = int_to_ptr.vmem [resolvable:$true] %s145_s4 }
  0x19   : > { %s134_s6 = scalar_lea.sflag [#allocation3], %s708_s25  ;;  %s475_s7 = scalar_lea.hbm %s717_s30, 256 }
  0x1a   : > { %p476_p2 = scmp.ne.s32.totalorder %s717_s30, %s475_s7  ;;  %p477_p3 = pneg %p725_p0 }
  0x1b   : > { %s480_s16 = scalar_lea.hbm %s878_s0, 512  ;;  %p481_p4 = scmp.lt.u32.totalorder %s717_s30, %s878_s0 }
  0x1c   : > { %p478_p5 = pnand %p477_p3, %p476_p2  ;;  %p482_p7 = scmp.lt.u32.totalorder %s480_s16, %s475_s7 }
  0x1d   : > { %p484_p13 = scmp.lt.u32.totalorder %s475_s7, %s717_s30 }
  0x1e   : > { %p479_p6 = pneg %p478_p5  ;;  %p483_p10 = por %p482_p7, %p481_p4 }
  0x20   : > { %p485_p12 = por %p484_p13, %p483_p10 }
  0x22   : > { %p486_p1 = pnand %p485_p12, %p479_p6 }
  0x24   : > { %489 = shalt.err (!%p486_p1)
}
  0x25   : > { %s490_s20 = scalar_lea.vmem %s721_s4, 256  ;;  %s623_s28 = smov [#allocation2]  }
  0x26   : > { %p491_p2 = scmp.ne.s32.totalorder %s721_s4, %s490_s20  ;;  %s495_s29 = sshll.u32 %s623_s28, 4  ;;  %s496_s29 = int_to_ptr.vmem [resolvable:$false] %s495_s29 }
  0x27   : > { %s497_s3 = scalar_lea.vmem %s496_s29, 512  ;;  %p498_p9 = scmp.lt.s32.totalorder %s721_s4, %s496_s29 }
  0x28   : > { %p493_p5 = pnand %p491_p2, %p477_p3  ;;  %p499_p4 = scmp.lt.s32.totalorder %s497_s3, %s490_s20 }
  0x2a   : > { %p494_p11 = pneg %p493_p5  ;;  %p500_p7 = por %p499_p4, %p498_p9 }
  0x2c   : > { %p501_p10 = pnand %p500_p7, %p494_p11 }
  0x2e   : > { %504 = shalt.err (!%p501_p10)
}
  0x2f   : > { %s624_s7 = smov 128   ;;  %s625_s8 = smov 8  }
  0x30   : > { %410 = dma.hbm_to_vmem [thread:$0]  (!%p725_p0), %s717_s30, 256, %s721_s4, %s134_s6, %s624_s7, %s624_s7, %s625_s8  }
  0x31   : > { %p175_p9 = scmp.lt.s32.totalorder %s621_s14, 3  ;;  %s767_s18 = scalar_lea.hbm %s879_s1, %s397_s27 }
  0x32   : > { %p888_p11 = scmp.ge.s32.totalorder %s621_s14, 1  ;;  %s159_s20 = scalar_lea.vmem [#allocation5], %s383_s26 }
  0x33   : > { %s167_s28 = sshll.u32 %s159_s20, 4  ;;  %s156_s30 = scalar_lea.sflag [#allocation6], %s708_s25  ;;  %s777_s28 = int_to_ptr.vmem [resolvable:$true] %s167_s28 }
  0x34   : > { %p771_p12 = pnand %p888_p11, %p175_p9  ;;  %s505_s4 = scalar_lea.hbm %s767_s18, 256 }
  0x35   : > { %p506_p1 = scmp.ne.s32.totalorder %s767_s18, %s505_s4  ;;  %s510_s29 = scalar_lea.hbm %s879_s1, 512 }
  0x36   : > { %p511_p2 = scmp.lt.u32.totalorder %s767_s18, %s879_s1  ;;  %p512_p5 = scmp.lt.u32.totalorder %s510_s29, %s505_s4 }
  0x37   : > { %p508_p6 = pnand %p506_p1, %p477_p3  ;;  %p514_p7 = scmp.lt.u32.totalorder %s505_s4, %s767_s18 }
  0x38   : > { %p513_p4 = por %p512_p5, %p511_p2 }
  0x39   : > { %p509_p13 = pneg %p508_p6 }
  0x3a   : > { %p515_p10 = por %p514_p7, %p513_p4 }
  0x3c   : > { %p516_p9 = pnand %p515_p10, %p509_p13 }
  0x3e   : > { %519 = shalt.err (!%p516_p9)
}
  0x3f   : > { %s520_s26 = scalar_lea.vmem %s777_s28, 256  ;;  %s626_s16 = smov [#allocation5]  }
  0x40   : > { %p521_p11 = scmp.ne.s32.totalorder %s777_s28, %s520_s26  ;;  %s525_s20 = sshll.u32 %s626_s16, 4  ;;  %s526_s20 = int_to_ptr.vmem [resolvable:$false] %s525_s20 }
  0x41   : > { %s527_s27 = scalar_lea.vmem %s526_s20, 512  ;;  %p528_p8 = scmp.lt.s32.totalorder %s777_s28, %s526_s20 }
  0x42   : > { %p523_p1 = pnand %p521_p11, %p477_p3  ;;  %p529_p2 = scmp.lt.s32.totalorder %s527_s27, %s520_s26 }
  0x44   : > { %p524_p6 = pneg %p523_p1  ;;  %p530_p5 = por %p529_p2, %p528_p8 }
  0x46   : > { %p531_p4 = pnand %p530_p5, %p524_p6 }
  0x48   : > { %534 = shalt.err (!%p531_p4)
}
  0x49   : > { %413 = dma.hbm_to_vmem [thread:$0]  (!%p725_p0), %s767_s18, 256, %s777_s28, %s156_s30, %s624_s7, %s624_s7, %s625_s8  }
  0x4a   : > { %179 = sbr.rel (%p771_p12) target bundleno = 326 (0x146), region = 28  ;;  %s811_s4 = sand.u32 (!%p771_p12), 1, %s605_s10  }
  0x4b   : > { %s390_s6 = sshll.u32 (!%p771_p12), %s811_s4, 4  ;;  %s182_s29 = scalar_lea.sflag (!%p771_p12), [#allocation3], %s811_s4 }
  0x4c   : > { %s185_s5 = scalar_lea.vmem (!%p771_p12), [#allocation2], %s390_s6  ;;  %p890_p8 = scmp.ne.s32.totalorder (!%p771_p12), %s884_s21, 0 }
  0x51   : > { %588 = dma.done.wait (%p890_p8), %s182_s29, 256  }
  0x52   : > { %590 = vsyncadd (%p890_p8), %s182_s29, 4294967040  ;;  %s191_s25 = scalar_lea.sflag [#allocation6], %s811_s4  ;;  %s194_s7 = scalar_lea.vmem [#allocation5], %s390_s6 }
  0x53   : > { %592 = dma.done.wait (%p890_p8), %s191_s25, 256  }
  0x54   : > { %594 = vsyncadd (%p890_p8), %s191_s25, 4294967040  ;;  %v229_v0 = vld [vmem:[%s185_s5] sm:$0xff]  ;;  %v230_v1 = vld [vmem:[%s185_s5 + $0x8] sm:$0xff]  ;;  %s392_s21 = sshll.u32 %s811_s4, 3  ;;  %s394_s18 = sshll.u32 %s613_s12, 7 }
  0x55   : > { %v233_v2 = vmax.f32 %v229_v0, 1e-09  ;;  %v234_v3 = vmax.f32 %v230_v1, 1e-09  ;;  %v231_v7 = vld [vmem:[%s194_s7] sm:$0xff]  ;;  %v232_v9 = vld [vmem:[%s194_s7 + $0x8] sm:$0xff]  ;;  %s829_s26 = scalar_lea.hbm %s880_s2, %s394_s18 }
  0x56   : > { %s219_s28 = scalar_lea.vmem [#allocation7], %s392_s21  ;;  %s263_s16 = scalar_lea.sflag [#allocation4], %s811_s4 }
  0x57   : > { %471 = vlog2.f32 %v233_v2  ;;  %v235_v4 = vsub.f32 1.0, %v233_v2  ;;  %v236_v5 = vsub.f32 1.0, %v234_v3  ;;  %s276_s30 = sshll.u32 %s219_s28, 4  ;;  %p891_p3 = scmp.ne.s32.totalorder %s885_s22, 0  ;;  %s831_s30 = int_to_ptr.vmem [resolvable:$true] %s276_s30 }
  0x58   : > { %473 = vlog2.f32 %v234_v3  ;;  %s535_s20 = scalar_lea.vmem %s831_s30, 128  ;;  %s627_s12 = smov [#allocation7]  }
  0x59   : > { %v237_v6 = vmul.f32 %v235_v4, %v235_v4  ;;  %v238_v8 = vmul.f32 %v236_v5, %v236_v5  ;;  %p536_p0 = scmp.ne.s32.totalorder %s831_s30, %s535_s20  ;;  %s539_s27 = sshll.u32 %s627_s12, 4  ;;  %s540_s27 = int_to_ptr.vmem [resolvable:$false] %s539_s27 }
  0x5a   : > { %s541_s6 = scalar_lea.vmem %s540_s27, 256  ;;  %p542_p7 = scmp.lt.s32.totalorder %s831_s30, %s540_s27 }
  0x5b   : > { %v239_v10 = vmul.f32 %v237_v6, %v231_v7  ;;  %v240_v12 = vmul.f32 %v238_v8, %v232_v9  ;;  %p537_p12 = pnand %p536_p0, %p891_p3  ;;  %p543_p10 = scmp.lt.s32.totalorder %s541_s6, %s535_s20 }
  0x5d   : > { %p538_p13 = pneg %p537_p12  ;;  %p544_p9 = por %p543_p10, %p542_p7 }
  0x5f   : > { %p545_p11 = pnand %p544_p9, %p538_p13 }
  0x61   : > { %v472_v11 = vpop.eup %471 }
  0x62   : > { %v474_v13 = vpop.eup %473  ;;  %v242_v14 = vmul.f32 0.6931472, %v472_v11 }
  0x63   : > { %v244_v15 = vmul.f32 0.6931472, %v474_v13 }
  0x64   : > { %v245_v16 = vmul.f32 %v242_v14, %v239_v10 }
  0x65   : > { %v246_v17 = vmul.f32 %v244_v15, %v240_v12 }
  0x67   : > { %v247_v18 = vadd.f32 %v246_v17, %v245_v16 }
  0x69   : > { %248 = vadd.xlane.f32.xlu0 %v247_v18 }
  0xf6   : > { %v249_v19 = vpop.xlane.xlu0 %248 }
  0xf7   : > { %v250_v20 = vrot.slane %v249_v19, 4 }
  0xf9   : > { %v251_v21 = vadd.f32 %v250_v20, %v249_v19 }
  0xfb   : > { %v252_v22 = vrot.slane %v251_v21, 2 }
  0xfd   : > { %v253_v23 = vadd.f32 %v252_v22, %v251_v21 }
  0xff   : > { %v254_v24 = vrot.slane %v253_v23, 1 }
 0x101   : > { %v255_v25 = vadd.f32 %v254_v24, %v253_v23 }
 0x103   : > { %399 = vpush %v255_v25 }
 0x134   : > { %s400_s8 = spop %399 }
 0x135   : > { %s257_s19 = ssub.f32 0.0, %s400_s8 }
 0x137   : > { %v259_v26 = vstv %s257_s19 }
 0x138   : > { %261 = vst [vmem:[%s219_s28] sm:$0xff] %v259_v26 }
 0x139   : > { %548 = shalt.err (!%p545_p11)
}
 0x13a   : > { %s549_s4 = scalar_lea.hbm %s829_s26, 128  ;;  %s553_s25 = scalar_lea.hbm %s880_s2, 256 }
 0x13b   : > { %p550_p1 = scmp.ne.s32.totalorder %s829_s26, %s549_s4  ;;  %p554_p5 = scmp.lt.u32.totalorder %s829_s26, %s880_s2 }
 0x13c   : > { %p555_p4 = scmp.lt.u32.totalorder %s553_s25, %s549_s4  ;;  %p557_p0 = scmp.lt.u32.totalorder %s549_s4, %s829_s26 }
 0x13d   : > { %p551_p6 = pnand %p550_p1, %p891_p3 }
 0x13e   : > { %p556_p8 = por %p555_p4, %p554_p5 }
 0x13f   : > { %p552_p2 = pneg %p551_p6 }
 0x140   : > { %p558_p12 = por %p557_p0, %p556_p8 }
 0x142   : > { %p559_p13 = pnand %p558_p12, %p552_p2 }
 0x144   : > { %562 = shalt.err (!%p559_p13)
}
 0x145   : > { %405 = dma.vmem_to_hbm [thread:$0]  (%p891_p3), %s831_s30, 128, %s829_s26, %s263_s16  }
 0x146 PF: > { %s288_s8 = sand.u32 1, %s601_s9   ;;  %p892_p7 = scmp.ne.s32.totalorder %s886_s24, 0 }
 0x147   : > { %p893_p10 = scmp.ge.s32.totalorder %s621_s14, 2  ;;  %s289_s18 = scalar_lea.sflag [#allocation4], %s288_s8 }
 0x149   : > { %p415_p9 = pnand %p893_p10, %p892_p7 }
 0x14b   : > { %596 = dma.done.wait (!%p415_p9), %s289_s18, 128  }
 0x14c   : > { %598 = vsyncadd (!%p415_p9), %s289_s18, 4294967168  ;;  %s21_s14 = sadd.s32 1, %s621_s14   ;;  %s894_s9 = smov %s605_s10 }
 0x14d   : > { %p18_p11 = scmp.ge.s32.totalorder %s21_s14, 4   ;;  %s895_s10 = smov %s609_s11 }
 0x14e   : > { %s896_s11 = smov %s699_s23  ;;  %s897_s12 = smov %s617_s13 }
 0x14f   : > { %s898_s13 = smov %s900_s17  ;;  %20 = sbr.rel (!%p18_p11) target bundleno = 8 (0x8), region = 90 }
 0x156   :  { %294 = vsyncpa [#allocation3], 1 }
 0x157   :  { %296 = vsyncpa [#allocation3 + $0x1], 1 }
 0x158   :  { %297 = vsyncpa [#allocation6], 1 }
 0x159   :  { %299 = vsyncpa [#allocation6 + $0x1], 1 }
 0x15a   :  { %300 = vsyncpa [#allocation4], 1 }
 0x15b   :  { %302 = vsyncpa [#allocation4 + $0x1], 1 }

</bundles_post_ra>
